<compile_context>
chip_gen: v5e
topology: v5e:2x2
jax: 0.10.0
libtpu: 0.0.40
codegen_flags: <defaults>
</compile_context>

<pallas_src>
import functools

import jax
import jax.numpy as jnp
from jax.experimental import pallas as pl
from jax.experimental.pallas import tpu as pltpu

_NEG_SLOPE = 0.2


def _round_up(x, m):
    return ((x + m - 1) // m) * m


def _apply_act1(h, activation_1):
    if activation_1 == "Sigmoid":
        return jax.nn.sigmoid(h)
    if activation_1 == "ReLU":
        return jnp.maximum(h, 0.0)
    if activation_1 == "LeakyReLU":
        return jnp.where(h > 0, h, _NEG_SLOPE * h)
    raise ValueError(f"unknown activation_1: {activation_1}")


def _leaky_relu_02(h):
    return jnp.where(h > 0, h, _NEG_SLOPE * h)


def _discriminator_kernel(*refs, num_hidden, activation_1):
    # refs layout:
    #   x_ref,
    #   (w_ref, b_ref) * num_hidden,        hidden layers, W stored (in, out)
    #   w_last_row_ref (1, feat_dim), b_last_ref (1, 1),
    #   feat_ref (TILE_M, feat_dim), d_ref (TILE_M, 1)
    x_ref = refs[0]
    param_refs = refs[1:1 + 2 * num_hidden + 2]
    feat_ref = refs[-2]
    d_ref = refs[-1]

    h = x_ref[...]
    for lyr in range(num_hidden):
        w = param_refs[2 * lyr][...]
        b = param_refs[2 * lyr + 1][...].astype(jnp.float32)    # (1, out) broadcasts
        h = jnp.dot(h.astype(w.dtype), w,
                    preferred_element_type=jnp.float32) + b
        h = _apply_act1(h, activation_1) if lyr == 0 else _leaky_relu_02(h)

    # Final (feat_dim -> 1) layer: VPU multiply + lane reduce instead of a
    # wasteful 1-column MXU matmul.
    w_last = param_refs[-2][...].astype(jnp.float32)            # (1, feat_dim)
    b_last = param_refs[-1][...].astype(jnp.float32)            # (1, 1)
    d = jnp.sum(h * w_last, axis=-1, keepdims=True) + b_last    # (TILE_M, 1)

    feat_ref[...] = h.astype(feat_ref.dtype)
    d_ref[...] = d.astype(d_ref.dtype)


def make_discriminator_params(key, p, hidden_units, dtype=jnp.float32):
    """Init mimicking nn.Linear's U(-1/sqrt(fan_in), 1/sqrt(fan_in)).

    Weights are returned as (in_features, out_features); biases as (1, out).
    """
    params = []
    dims = [p] + list(hidden_units) + [1]
    for i in range(len(dims) - 1):
        fan_in, fan_out = dims[i], dims[i + 1]
        key, kw, kb = jax.random.split(key, 3)
        bound = 1.0 / (fan_in ** 0.5)
        w = jax.random.uniform(kw, (fan_in, fan_out), dtype, -bound, bound)
        b = jax.random.uniform(kb, (1, fan_out), dtype, -bound, bound)
        params.append((w, b))
    return params


def discriminator_forward(x, params, p, hidden_units, activation_1="LeakyReLU",
                          block_rows=8192, weight_dtype=None):
    """Pallas-backed forward. Returns (features, d) like the PyTorch module.

    `weight_dtype=jnp.bfloat16` (v6e/v7x) casts only the hidden-layer weights;
    x stays in its incoming dtype and is cast per-matmul inside the kernel
    (accumulation is always f32).  Leave None / f32 on v5e.
    """
    x2d = x.reshape(-1, p)                     # no wrapper-side dtype cast
    n = x2d.shape[0]
    num_hidden = len(hidden_units)
    feat_dim = hidden_units[-1]

    # Hidden-layer params stay (in, out); the final layer is flattened to a
    # (1, feat_dim) row + (1, 1) bias for the in-kernel VPU reduction.
    w_dt = weight_dtype if weight_dtype is not None else None
    flat_params = []
    for w, b in params[:-1]:
        flat_params.append(jnp.asarray(w, w_dt) if w_dt is not None
                           else jnp.asarray(w))
        flat_params.append(jnp.asarray(b, jnp.float32))
    w_last, b_last = params[-1]
    flat_params.append(jnp.asarray(w_last, jnp.float32).reshape(1, feat_dim))
    flat_params.append(jnp.asarray(b_last, jnp.float32).reshape(1, 1))

    # Batch tiling: tile rows must be a multiple of 8 (f32 sublane).  Pick the
    # tile so the grid has >=2 steps whenever the batch allows (megacore on
    # v7x + DMA/compute overlap), with minimal zero-padding.
    n8 = _round_up(max(n, 1), 8)
    tile_cap = max(8, (min(block_rows, n8) // 8) * 8)
    steps = pl.cdiv(n8, tile_cap)
    if steps < 2 and n8 >= 16:
        steps = 2
    tile_m = _round_up(pl.cdiv(n8, steps), 8)
    n_pad = steps * tile_m
    if n_pad != n:
        x2d = jnp.pad(x2d, ((0, n_pad - n), (0, 0)))
    grid = (steps,)

    in_specs = [pl.BlockSpec((tile_m, p), lambda i: (i, 0))]
    for arr in flat_params:
        # Full-extent block, constant index_map -> DMA'd once, resident in VMEM.
        in_specs.append(pl.BlockSpec(arr.shape, lambda i: (0, 0)))

    out_specs = (
        pl.BlockSpec((tile_m, feat_dim), lambda i: (i, 0)),
        pl.BlockSpec((tile_m, 1), lambda i: (i, 0)),
    )
    out_shape = (
        jax.ShapeDtypeStruct((n_pad, feat_dim), jnp.float32),
        jax.ShapeDtypeStruct((n_pad, 1), jnp.float32),
    )

    # Advisory cost estimate: the call is HBM-bound at these feature widths.
    dims = [p] + list(hidden_units) + [1]
    flops = 2 * n_pad * sum(dims[i] * dims[i + 1] for i in range(len(dims) - 1))
    transcendentals = n_pad * hidden_units[0] if activation_1 == "Sigmoid" else 0
    param_bytes = sum(int(a.size) * a.dtype.itemsize for a in flat_params)
    bytes_accessed = (n_pad * (p * x2d.dtype.itemsize + (feat_dim + 1) * 4)
                      + param_bytes)
    cost = pl.CostEstimate(flops=flops, transcendentals=transcendentals,
                           bytes_accessed=bytes_accessed)

    kernel = functools.partial(
        _discriminator_kernel,
        num_hidden=num_hidden,
        activation_1=activation_1,
    )

    feat_pad, d_pad = pl.pallas_call(
        kernel,
        out_shape=out_shape,
        grid=grid,
        in_specs=in_specs,
        out_specs=out_specs,
        compiler_params=pltpu.CompilerParams(
            dimension_semantics=("parallel",),     # megacore sharding on v7x
            vmem_limit_bytes=32 * 1024 * 1024,
        ),
        cost_estimate=cost,
    )(x2d, *flat_params)

    feat = feat_pad[:n]
    d = jnp.squeeze(d_pad[:n])     # matches PyTorch's .squeeze()
    return feat, d


if __name__ == "__main__":
    # Small shapes consistent with the module: p=16, hidden_units=[32, 16].
    p = 16
    hidden_units = [32, 16]
    activation_1 = "LeakyReLU"
    batch = 200          # exercises >=2 grid steps and row padding

    key = jax.random.PRNGKey(0)
    key, kx = jax.random.split(key)
    x = jax.random.normal(kx, (batch, p), dtype=jnp.float32)

    params = make_discriminator_params(key, p, hidden_units)

    feat, d = discriminator_forward(x, params, p, hidden_units, activation_1,
                                    block_rows=128)
    jax.block_until_ready((feat, d))

    # Pure-JAX reference (same math, no Pallas).
    h_ref = x
    for i, (w, b) in enumerate(params[:-1]):
        h_ref = h_ref @ w + b
        h_ref = _apply_act1(h_ref, activation_1) if i == 0 else _leaky_relu_02(h_ref)
    w_l, b_l = params[-1]
    d_ref = jnp.squeeze(h_ref @ w_l + b_l)

    assert feat.shape == (batch, hidden_units[-1]), feat.shape
    assert d.shape == (batch,), d.shape
    assert jnp.allclose(feat, h_ref, atol=1e-5, rtol=1e-5)
    assert jnp.allclose(d, d_ref, atol=1e-5, rtol=1e-5)

    print("KERNEL_OK")
</pallas_src>

<mosaic_0001>
module attributes {stable_mosaic.version = 11 : i64} {
  func.func @_discriminator_kernel(%arg0: i32, %arg1: memref<104x16xf32, #tpu.memory_space<vmem>>, %arg2: memref<16x32xf32, #tpu.memory_space<vmem>>, %arg3: memref<1x32xf32, #tpu.memory_space<vmem>>, %arg4: memref<32x16xf32, #tpu.memory_space<vmem>>, %arg5: memref<1x16xf32, #tpu.memory_space<vmem>>, %arg6: memref<1x16xf32, #tpu.memory_space<vmem>>, %arg7: memref<1x1xf32, #tpu.memory_space<vmem>>, %arg8: memref<104x16xf32, #tpu.memory_space<vmem>>, %arg9: memref<104x1xf32, #tpu.memory_space<vmem>>) attributes {dimension_semantics = [#tpu.dimension_semantics<parallel>], iteration_bounds = array<i64: 2>, scalar_prefetch = 0 : i64, scratch_operands = 0 : i64, tpu.core_type = #tpu.core_type<tc>, window_params = [{transform_indices = @transform_0, window_bounds = array<i64: 104, 16>}, {pipeline_mode = #tpu.pipeline_mode<synchronous>, transform_indices = @transform_1, window_bounds = array<i64: 16, 32>}, {pipeline_mode = #tpu.pipeline_mode<synchronous>, transform_indices = @transform_2, window_bounds = array<i64: 1, 32>}, {pipeline_mode = #tpu.pipeline_mode<synchronous>, transform_indices = @transform_3, window_bounds = array<i64: 32, 16>}, {pipeline_mode = #tpu.pipeline_mode<synchronous>, transform_indices = @transform_4, window_bounds = array<i64: 1, 16>}, {pipeline_mode = #tpu.pipeline_mode<synchronous>, transform_indices = @transform_5, window_bounds = array<i64: 1, 16>}, {pipeline_mode = #tpu.pipeline_mode<synchronous>, transform_indices = @transform_6, window_bounds = array<i64: 1, 1>}, {transform_indices = @transform_7, window_bounds = array<i64: 104, 16>}, {transform_indices = @transform_8, window_bounds = array<i64: 104, 1>}]} {
    %c0 = arith.constant 0 : index
    %c0_0 = arith.constant 0 : index
    %0 = vector.load %arg1[%c0, %c0_0] : memref<104x16xf32, #tpu.memory_space<vmem>>, vector<104x16xf32>
    %c0_1 = arith.constant 0 : index
    %c0_2 = arith.constant 0 : index
    %1 = vector.load %arg2[%c0_1, %c0_2] : memref<16x32xf32, #tpu.memory_space<vmem>>, vector<16x32xf32>
    %c0_3 = arith.constant 0 : index
    %c0_4 = arith.constant 0 : index
    %2 = vector.load %arg3[%c0_3, %c0_4] : memref<1x32xf32, #tpu.memory_space<vmem>>, vector<1x32xf32>
    %cst = arith.constant dense<0.000000e+00> : vector<104x32xf32>
    %3 = tpu.matmul %0, %1, %cst {dimension_numbers = #tpu.dot_dimension_numbers<[1], [0], [0], [1], [0, 0, 1, 1], [], []>} : vector<104x16xf32>, vector<16x32xf32>, vector<104x32xf32> -> vector<104x32xf32>
    %4 = vector.broadcast %2 : vector<1x32xf32> to vector<104x32xf32>
    %5 = arith.addf %3, %4 : vector<104x32xf32>
    %cst_5 = arith.constant 0.000000e+00 : f32
    %6 = vector.broadcast %cst_5 : f32 to vector<104x32xf32>
    %7 = arith.cmpf ogt, %5, %6 : vector<104x32xf32>
    %cst_6 = arith.constant 2.000000e-01 : f32
    %8 = vector.broadcast %cst_6 : f32 to vector<104x32xf32>
    %9 = arith.mulf %8, %5 : vector<104x32xf32>
    %10 = arith.select %7, %5, %9 : vector<104x32xi1>, vector<104x32xf32>
    %c0_7 = arith.constant 0 : index
    %c0_8 = arith.constant 0 : index
    %11 = vector.load %arg4[%c0_7, %c0_8] : memref<32x16xf32, #tpu.memory_space<vmem>>, vector<32x16xf32>
    %c0_9 = arith.constant 0 : index
    %c0_10 = arith.constant 0 : index
    %12 = vector.load %arg5[%c0_9, %c0_10] : memref<1x16xf32, #tpu.memory_space<vmem>>, vector<1x16xf32>
    %cst_11 = arith.constant dense<0.000000e+00> : vector<104x16xf32>
    %13 = tpu.matmul %10, %11, %cst_11 {dimension_numbers = #tpu.dot_dimension_numbers<[1], [0], [0], [1], [0, 0, 1, 1], [], []>} : vector<104x32xf32>, vector<32x16xf32>, vector<104x16xf32> -> vector<104x16xf32>
    %14 = vector.broadcast %12 : vector<1x16xf32> to vector<104x16xf32>
    %15 = arith.addf %13, %14 : vector<104x16xf32>
    %cst_12 = arith.constant 0.000000e+00 : f32
    %16 = vector.broadcast %cst_12 : f32 to vector<104x16xf32>
    %17 = arith.cmpf ogt, %15, %16 : vector<104x16xf32>
    %cst_13 = arith.constant 2.000000e-01 : f32
    %18 = vector.broadcast %cst_13 : f32 to vector<104x16xf32>
    %19 = arith.mulf %18, %15 : vector<104x16xf32>
    %20 = arith.select %17, %15, %19 : vector<104x16xi1>, vector<104x16xf32>
    %c0_14 = arith.constant 0 : index
    %c0_15 = arith.constant 0 : index
    %21 = vector.load %arg6[%c0_14, %c0_15] : memref<1x16xf32, #tpu.memory_space<vmem>>, vector<1x16xf32>
    %c0_16 = arith.constant 0 : index
    %c0_17 = arith.constant 0 : index
    %22 = vector.load %arg7[%c0_16, %c0_17] : memref<1x1xf32, #tpu.memory_space<vmem>>, vector<1x1xf32>
    %23 = vector.broadcast %21 : vector<1x16xf32> to vector<104x16xf32>
    %24 = arith.mulf %20, %23 : vector<104x16xf32>
    %cst_18 = arith.constant dense<0.000000e+00> : vector<104xf32>
    %25 = vector.multi_reduction <add>, %24, %cst_18 [1] : vector<104x16xf32> to vector<104xf32>
    %26 = vector.shape_cast %25 : vector<104xf32> to vector<104x1xf32>
    %27 = vector.broadcast %22 : vector<1x1xf32> to vector<104x1xf32>
    %28 = arith.addf %26, %27 : vector<104x1xf32>
    %c0_19 = arith.constant 0 : index
    %c0_20 = arith.constant 0 : index
    %29 = vector.load %arg8[%c0_19, %c0_20] : memref<104x16xf32, #tpu.memory_space<vmem>>, vector<104x16xf32>
    tpu.vector_store %arg8[%c0_19, %c0_20], %20 {strides = array<i32>} : memref<104x16xf32, #tpu.memory_space<vmem>>, vector<104x16xf32>,
    %c0_21 = arith.constant 0 : index
    %c0_22 = arith.constant 0 : index
    %30 = vector.load %arg9[%c0_21, %c0_22] : memref<104x1xf32, #tpu.memory_space<vmem>>, vector<104x1xf32>
    tpu.vector_store %arg9[%c0_21, %c0_22], %28 {strides = array<i32>} : memref<104x1xf32, #tpu.memory_space<vmem>>, vector<104x1xf32>,
    return
  }
  func.func @transform_0(%arg0: i32) -> (i32, i32) {
    %c0_i32 = arith.constant 0 : i32
    %c0_i32_0 = arith.constant 0 : i32
    return %arg0, %c0_i32 : i32, i32
  }
  func.func @transform_1(%arg0: i32) -> (i32, i32) {
    %c0_i32 = arith.constant 0 : i32
    %c0_i32_0 = arith.constant 0 : i32
    %c0_i32_1 = arith.constant 0 : i32
    return %c0_i32, %c0_i32_0 : i32, i32
  }
  func.func @transform_2(%arg0: i32) -> (i32, i32) {
    %c0_i32 = arith.constant 0 : i32
    %c0_i32_0 = arith.constant 0 : i32
    %c0_i32_1 = arith.constant 0 : i32
    return %c0_i32, %c0_i32_0 : i32, i32
  }
  func.func @transform_3(%arg0: i32) -> (i32, i32) {
    %c0_i32 = arith.constant 0 : i32
    %c0_i32_0 = arith.constant 0 : i32
    %c0_i32_1 = arith.constant 0 : i32
    return %c0_i32, %c0_i32_0 : i32, i32
  }
  func.func @transform_4(%arg0: i32) -> (i32, i32) {
    %c0_i32 = arith.constant 0 : i32
    %c0_i32_0 = arith.constant 0 : i32
    %c0_i32_1 = arith.constant 0 : i32
    return %c0_i32, %c0_i32_0 : i32, i32
  }
  func.func @transform_5(%arg0: i32) -> (i32, i32) {
    %c0_i32 = arith.constant 0 : i32
    %c0_i32_0 = arith.constant 0 : i32
    %c0_i32_1 = arith.constant 0 : i32
    return %c0_i32, %c0_i32_0 : i32, i32
  }
  func.func @transform_6(%arg0: i32) -> (i32, i32) {
    %c0_i32 = arith.constant 0 : i32
    %c0_i32_0 = arith.constant 0 : i32
    %c0_i32_1 = arith.constant 0 : i32
    return %c0_i32, %c0_i32_0 : i32, i32
  }
  func.func @transform_7(%arg0: i32) -> (i32, i32) {
    %c0_i32 = arith.constant 0 : i32
    %c0_i32_0 = arith.constant 0 : i32
    return %arg0, %c0_i32 : i32, i32
  }
  func.func @transform_8(%arg0: i32) -> (i32, i32) {
    %c0_i32 = arith.constant 0 : i32
    %c0_i32_0 = arith.constant 0 : i32
    return %arg0, %c0_i32 : i32, i32
  }
}

</mosaic_0001>

<bundles_post_ra>
// kernel: tpu_custom_call.1
= control target key start
LH: loop header
LB: loop body
LE: loop exit
PB: predicated region body
PF: predicated region fallthrough
CT: control target
= control target key end

     0   :  { %s922_s29 = smov 0   ;;  %s1114_s0 = inlined_call_operand.vmem [shape: f32[208,16], index: 0, kind: input, shape index: {}]   ;;  %s1115_s1 = inlined_call_operand.vmem [shape: f32[16,32], index: 1, kind: input, shape index: {}]   ;;  %s1116_s2 = inlined_call_operand.vmem [shape: f32[1,32], index: 2, kind: input, shape index: {}]   ;;  %s1117_s3 = inlined_call_operand.vmem [shape: f32[32,16], index: 3, kind: input, shape index: {}]   ;;  %s1118_s4 = inlined_call_operand.vmem [shape: f32[1,16], index: 4, kind: input, shape index: {}]   ;;  %s1119_s5 = inlined_call_operand.vmem [shape: f32[1,16], index: 5, kind: input, shape index: {}]   ;;  %s1120_s6 = inlined_call_operand.<no memory space> [shape: f32[1,1], index: 6, kind: input, shape index: {}]   ;;  %s1121_s7 = inlined_call_operand.vmem [shape: f32[208,16], index: 7, kind: output, shape index: {0}]   ;;  %s1122_s8 = inlined_call_operand.vmem [shape: f32[208,1], index: 8, kind: output, shape index: {1}]  }
   0x1   :  { %v14_v0 = vstv %s1120_s6 }
   0x2   :  { %15 = vst [vmem:[#allocation2] sm:$0x1] %v14_v0 }
   0x3 LB: > { %s812_s30 = sadd.s32 4294967295, %s872_s29   ;;  %p816_p0 = scmp.ge.s32.totalorder %s872_s29, 1  ;;  %s872_s29 = sphi %s922_s29, %s21_s29  }
   0x4   : > { %p268_p1 = scmp.lt.s32.totalorder %s872_s29, 3 }
   0x6   : > { %p269_p2 = pnand %p816_p0, %p268_p1 }
   0x7   : > { %s307_s12 = smul.u32 (!%p269_p2), 13, %s812_s30 }
   0x8   : > { %272 = sbr.rel (%p269_p2) target bundleno = 457 (0x1c9), region = 48 }
   0x9   : > { %p308_p3 = scmp.lt.s32.totalorder (!%p269_p2), %s307_s12, 25 }
   0xd   : > { %v339_v1 = vld [vmem:[%s1115_s1 + $0x8] sm:$0xff]  ;;  %v338_v2 = vld [vmem:[%s1115_s1] sm:$0xff]  ;;  %s1124_s12 = smov (!%p308_p3, %s307_s12), 25  ;;  %vm344_vm0 = vcmask 130048   ;;  %v482_v9 = vld [vmem:[%s1117_s3 + $0x18] sm:$0xff]  ;;  %vm487_vm2 = vcmask 261120  }
   0xe   : > { %398 = vmatpush.msra.mxu0 %v339_v1  ;;  %848 = vmatpush.msra.mxu3 %v339_v1  ;;  %s936_s13 = sshll.u32 %s1124_s12, 3  ;;  %v481_v17 = vld [vmem:[%s1117_s3 + $0x10] sm:$0xff]  ;;  %v480_v18 = vld [vmem:[%s1117_s3 + $0x8] sm:$0xff]  ;;  %v479_v19 = vld [vmem:[%s1117_s3] sm:$0xff] }
   0xf   : > { %s311_s16 = scalar_lea.vmem %s1114_s0, %s936_s13  ;;  %539 = vmatpush.msra.mxu1 %v482_v9  ;;  %850 = vmatpush.msra.mxu2 %v482_v9  ;;  %v970_v20 = vld [vmem:[%s1116_s2] ss:$0 sm:$0xff]  ;;  %s1013_s11 = scalar_lea.vmem %s1121_s7, %s936_s13 }
  0x10   : > { %399 = vmatpush.msra.mxu0 %v338_v2  ;;  %849 = vmatpush.msra.mxu3 %v338_v2  ;;  %v325_v3 = vld [vmem:[%s311_s16] sm:$0xff]  ;;  %v332_v4 = vld [vmem:[%s311_s16 + $0x38] sm:$0xff]  ;;  %v326_v5 = vld [vmem:[%s311_s16 + $0x8] sm:$0xff]  ;;  %s1083_s15 = scalar_lea.vmem %s1122_s8, %s936_s13 }
  0x11   : > { %820 = vmatmul.msk.f32.vlgmr.msra.gmra.mxu0 %vm344_vm0, %v325_v3  ;;  %827 = vmatmul.msk.f32.vlgmr.msra.gmra.mxu3 %vm344_vm0, %v332_v4  ;;  %v333_v6 = vld [vmem:[%s311_s16 + $0x40] sm:$0xff]  ;;  %v327_v7 = vld [vmem:[%s311_s16 + $0x10] sm:$0xff]  ;;  %v334_v8 = vld [vmem:[%s311_s16 + $0x48] sm:$0xff] }
  0x12   : > { %v328_v10 = vld [vmem:[%s311_s16 + $0x18] sm:$0xff]  ;;  %v335_v11 = vld [vmem:[%s311_s16 + $0x50] sm:$0xff]  ;;  %v329_v12 = vld [vmem:[%s311_s16 + $0x20] sm:$0xff]  ;;  %540 = vmatpush.msra.mxu1 %v481_v17  ;;  %851 = vmatpush.msra.mxu2 %v481_v17 }
  0x13   : > { %v336_v13 = vld [vmem:[%s311_s16 + $0x58] sm:$0xff]  ;;  %v330_v14 = vld [vmem:[%s311_s16 + $0x28] sm:$0xff]  ;;  %v337_v15 = vld [vmem:[%s311_s16 + $0x60] sm:$0xff] }
  0x14   : > { %v331_v16 = vld [vmem:[%s311_s16 + $0x30] sm:$0xff]  ;;  %541 = vmatpush.msra.mxu1 %v480_v18  ;;  %852 = vmatpush.msra.mxu2 %v480_v18  ;;  %v1001_v9 = vld [vmem:[%s1118_s4] ss:$0 sm:$0xff] }
  0x16   : > { %542 = vmatpush.msra.mxu1 %v479_v19  ;;  %853 = vmatpush.msra.mxu2 %v479_v19 }
  0x19   : > { %821 = vmatmul.msk.f32.gmra.mxu0 %vm344_vm0, %v326_v5  ;;  %828 = vmatmul.msk.f32.gmra.mxu3 %vm344_vm0, %v333_v6 }
  0x21   : > { %822 = vmatmul.msk.f32.gmra.mxu0 %vm344_vm0, %v327_v7  ;;  %829 = vmatmul.msk.f32.gmra.mxu3 %vm344_vm0, %v334_v8 }
  0x29   : > { %823 = vmatmul.msk.f32.gmra.mxu0 %vm344_vm0, %v328_v10  ;;  %830 = vmatmul.msk.f32.gmra.mxu3 %vm344_vm0, %v335_v11 }
  0x31   : > { %824 = vmatmul.msk.f32.gmra.mxu0 %vm344_vm0, %v329_v12  ;;  %831 = vmatmul.msk.f32.gmra.mxu3 %vm344_vm0, %v336_v13  ;;  %v1007_v12 = vld [vmem:[%s1119_s5] ss:$0 sm:$0xff] }
  0x39   : > { %825 = vmatmul.msk.f32.gmra.mxu0 %vm344_vm0, %v330_v14  ;;  %832 = vmatmul.msk.f32.gmra.mxu3 %vm344_vm0, %v337_v15 }
  0x41   : > { %826 = vmatmul.msk.f32.gmra.mxu0 %vm344_vm0, %v331_v16 }
  0x8e   : > { %v401_v21 = vpop.f32.mrf.mxu0 }
  0x8f   : > { %v402_v22 = vadd.f32 %v970_v20, %v401_v21 }
  0x91   : > { %v453_v23 = vmul.f32 0.2, %v402_v22  ;;  %vm440_vm1 = vcmp.gt.f32.partialorder %v402_v22, 0.0 }
  0x93   : > { %v466_v24 = vsel %vm440_vm1, %v402_v22, %v453_v23 }
  0x94   : > { %v422_v25 = vpop.f32.mrf.mxu3  ;;  %833 = vmatmul.msk.f32.vlgmr.msra.gmra.mxu1 %vm487_vm2, %v466_v24 }
  0x95   : > { %v423_v26 = vadd.f32 %v970_v20, %v422_v25 }
  0x96   : > { %v404_v27 = vpop.f32.mrf.mxu0 }
  0x97   : > { %v460_v28 = vmul.f32 0.2, %v423_v26  ;;  %v405_v29 = vadd.f32 %v970_v20, %v404_v27  ;;  %vm447_vm3 = vcmp.gt.f32.partialorder %v423_v26, 0.0 }
  0x99   : > { %v454_v30 = vmul.f32 0.2, %v405_v29  ;;  %v473_v31 = vsel %vm447_vm3, %v423_v26, %v460_v28  ;;  %vm441_vm4 = vcmp.gt.f32.partialorder %v405_v29, 0.0 }
  0x9a   : > { %840 = vmatmul.msk.f32.vlgmr.msra.gmra.mxu2 %vm487_vm2, %v473_v31 }
  0x9b   : > { %v467_v32 = vsel %vm441_vm4, %v405_v29, %v454_v30 }
  0x9c   : > { %v425_v33 = vpop.f32.mrf.mxu3  ;;  %834 = vmatmul.msk.f32.gmra.mxu1 %vm487_vm2, %v467_v32 }
  0x9d   : > { %v426_v34 = vadd.f32 %v970_v20, %v425_v33 }
  0x9e   : > { %v407_v35 = vpop.f32.mrf.mxu0 }
  0x9f   : > { %v461_v36 = vmul.f32 0.2, %v426_v34  ;;  %v408_v37 = vadd.f32 %v970_v20, %v407_v35  ;;  %vm448_vm5 = vcmp.gt.f32.partialorder %v426_v34, 0.0 }
  0xa1   : > { %v455_v38 = vmul.f32 0.2, %v408_v37  ;;  %v474_v39 = vsel %vm448_vm5, %v426_v34, %v461_v36  ;;  %vm442_vm6 = vcmp.gt.f32.partialorder %v408_v37, 0.0 }
  0xa2   : > { %841 = vmatmul.msk.f32.gmra.mxu2 %vm487_vm2, %v474_v39 }
  0xa3   : > { %v468_v40 = vsel %vm442_vm6, %v408_v37, %v455_v38 }
  0xa4   : > { %v428_v41 = vpop.f32.mrf.mxu3  ;;  %835 = vmatmul.msk.f32.gmra.mxu1 %vm487_vm2, %v468_v40 }
  0xa5   : > { %v429_v42 = vadd.f32 %v970_v20, %v428_v41 }
  0xa6   : > { %v410_v43 = vpop.f32.mrf.mxu0 }
  0xa7   : > { %v462_v44 = vmul.f32 0.2, %v429_v42  ;;  %v411_v45 = vadd.f32 %v970_v20, %v410_v43  ;;  %vm449_vm7 = vcmp.gt.f32.partialorder %v429_v42, 0.0 }
  0xa9   : > { %v456_v46 = vmul.f32 0.2, %v411_v45  ;;  %v475_v47 = vsel %vm449_vm7, %v429_v42, %v462_v44  ;;  %vm443_vm8 = vcmp.gt.f32.partialorder %v411_v45, 0.0 }
  0xaa   : > { %842 = vmatmul.msk.f32.gmra.mxu2 %vm487_vm2, %v475_v47 }
  0xab   : > { %v469_v48 = vsel %vm443_vm8, %v411_v45, %v456_v46 }
  0xac   : > { %v431_v49 = vpop.f32.mrf.mxu3  ;;  %836 = vmatmul.msk.f32.gmra.mxu1 %vm487_vm2, %v469_v48 }
  0xad   : > { %v432_v50 = vadd.f32 %v970_v20, %v431_v49 }
  0xae   : > { %v413_v51 = vpop.f32.mrf.mxu0 }
  0xaf   : > { %v463_v52 = vmul.f32 0.2, %v432_v50  ;;  %v414_v53 = vadd.f32 %v970_v20, %v413_v51  ;;  %vm450_vm9 = vcmp.gt.f32.partialorder %v432_v50, 0.0 }
  0xb1   : > { %v457_v54 = vmul.f32 0.2, %v414_v53  ;;  %v476_v55 = vsel %vm450_vm9, %v432_v50, %v463_v52  ;;  %vm444_vm10 = vcmp.gt.f32.partialorder %v414_v53, 0.0 }
  0xb2   : > { %843 = vmatmul.msk.f32.gmra.mxu2 %vm487_vm2, %v476_v55 }
  0xb3   : > { %v470_v56 = vsel %vm444_vm10, %v414_v53, %v457_v54 }
  0xb4   : > { %v434_v57 = vpop.f32.mrf.mxu3  ;;  %837 = vmatmul.msk.f32.gmra.mxu1 %vm487_vm2, %v470_v56 }
  0xb5   : > { %v435_v58 = vadd.f32 %v970_v20, %v434_v57 }
  0xb6   : > { %v416_v59 = vpop.f32.mrf.mxu0 }
  0xb7   : > { %v464_v60 = vmul.f32 0.2, %v435_v58  ;;  %v417_v61 = vadd.f32 %v970_v20, %v416_v59  ;;  %vm451_vm11 = vcmp.gt.f32.partialorder %v435_v58, 0.0 }
  0xb9   : > { %v458_v62 = vmul.f32 0.2, %v417_v61  ;;  %v477_v63 = vsel %vm451_vm11, %v435_v58, %v464_v60  ;;  %vm445_vm12 = vcmp.gt.f32.partialorder %v417_v61, 0.0 }
  0xba   : > { %844 = vmatmul.msk.f32.gmra.mxu2 %vm487_vm2, %v477_v63 }
  0xbb   : > { %v471_v0 = vsel %vm445_vm12, %v417_v61, %v458_v62 }
  0xbc   : > { %v437_v1 = vpop.f32.mrf.mxu3  ;;  %838 = vmatmul.msk.f32.gmra.mxu1 %vm487_vm2, %v471_v0 }
  0xbd   : > { %v438_v2 = vadd.f32 %v970_v20, %v437_v1 }
  0xbe   : > { %v419_v3 = vpop.f32.mrf.mxu0 }
  0xbf   : > { %v465_v4 = vmul.f32 0.2, %v438_v2  ;;  %v420_v5 = vadd.f32 %v970_v20, %v419_v3  ;;  %vm452_vm13 = vcmp.gt.f32.partialorder %v438_v2, 0.0 }
  0xc1   : > { %v459_v6 = vmul.f32 0.2, %v420_v5  ;;  %v478_v7 = vsel %vm452_vm13, %v438_v2, %v465_v4  ;;  %vm446_vm14 = vcmp.gt.f32.partialorder %v420_v5, 0.0  ;;  %vm708_vm13 = vcmask 7168  }
  0xc2   : > { %845 = vmatmul.msk.f32.gmra.mxu2 %vm487_vm2, %v478_v7 }
  0xc3   : > { %v472_v8 = vsel %vm446_vm14, %v420_v5, %v459_v6 }
  0xc4   : > { %839 = vmatmul.msk.f32.gmra.mxu1 %vm487_vm2, %v472_v8 }
 0x111   : > { %v544_v10 = vpop.f32.mrf.mxu1 }
 0x112   : > { %v545_v11 = vadd.f32 %v1001_v9, %v544_v10 }
 0x114   : > { %v596_v13 = vmul.f32 0.2, %v545_v11  ;;  %vm583_vm15 = vcmp.gt.f32.partialorder %v545_v11, 0.0 }
 0x116   : > { %v609_v14 = vsel %vm583_vm15, %v545_v11, %v596_v13 }
 0x117   : > { %v627_v15 = vmul.f32 %v1007_v12, %v609_v14  ;;  %695 = vst.msk [vmem:[%s1013_s11] sm:$0xff] %vm344_vm0, %v609_v14 }
 0x119   : > { %v547_v16 = vpop.f32.mrf.mxu1  ;;  %v640_v17 = vsel %vm344_vm0, %v627_v15, 0.0 }
 0x11a   : > { %v548_v18 = vadd.f32 %v1001_v9, %v547_v16  ;;  %641 = vadd.xlane.f32.xlu0 %v640_v17 }
 0x11c   : > { %vm584_vm1 = vcmp.gt.f32.partialorder %v548_v18, 0.0  ;;  %v597_v19 = vmul.f32 0.2, %v548_v18 }
 0x11d   : > { %v565_v20 = vpop.f32.mrf.mxu2 }
 0x11e   : > { %v566_v21 = vadd.f32 %v1001_v9, %v565_v20  ;;  %v610_v22 = vsel %vm584_vm1, %v548_v18, %v597_v19 }
 0x11f   : > { %v628_v23 = vmul.f32 %v1007_v12, %v610_v22  ;;  %696 = vst.msk [vmem:[%s1013_s11 + $0x8] sm:$0xff] %vm344_vm0, %v610_v22 }
 0x120   : > { %v603_v24 = vmul.f32 0.2, %v566_v21  ;;  %vm590_vm2 = vcmp.gt.f32.partialorder %v566_v21, 0.0 }
 0x121   : > { %v550_v25 = vpop.f32.mrf.mxu1  ;;  %v643_v26 = vsel %vm344_vm0, %v628_v23, 0.0 }
 0x122   : > { %v551_v27 = vadd.f32 %v1001_v9, %v550_v25  ;;  %644 = vadd.xlane.f32.xlu0 %v643_v26  ;;  %v616_v28 = vsel %vm590_vm2, %v566_v21, %v603_v24  ;;  %v865_v26 = vld [vmem:[#allocation2] ss:$0 sm:$0xff] }
 0x123   : > { %v634_v29 = vmul.f32 %v1007_v12, %v616_v28  ;;  %702 = vst.msk [vmem:[%s1013_s11 + $0x38] sm:$0xff] %vm344_vm0, %v616_v28 }
 0x124   : > { %vm585_vm3 = vcmp.gt.f32.partialorder %v551_v27, 0.0  ;;  %v598_v30 = vmul.f32 0.2, %v551_v27 }
 0x125   : > { %v568_v31 = vpop.f32.mrf.mxu2  ;;  %v661_v32 = vsel %vm344_vm0, %v634_v29, 0.0 }
 0x126   : > { %v569_v33 = vadd.f32 %v1001_v9, %v568_v31  ;;  %662 = vadd.xlane.f32.xlu1 %v661_v32  ;;  %v611_v34 = vsel %vm585_vm3, %v551_v27, %v598_v30 }
 0x127   : > { %697 = vst.msk [vmem:[%s1013_s11 + $0x10] sm:$0xff] %vm344_vm0, %v611_v34  ;;  %v629_v37 = vmul.f32 %v1007_v12, %v611_v34 }
 0x128   : > { %v604_v35 = vmul.f32 0.2, %v569_v33  ;;  %vm591_vm4 = vcmp.gt.f32.partialorder %v569_v33, 0.0 }
 0x129   : > { %v553_v36 = vpop.f32.mrf.mxu1  ;;  %v646_v44 = vsel %vm344_vm0, %v629_v37, 0.0 }
 0x12a   : > { %v554_v38 = vadd.f32 %v1001_v9, %v553_v36  ;;  %v617_v39 = vsel %vm591_vm4, %v569_v33, %v604_v35 }
 0x12b   : > { %v635_v40 = vmul.f32 %v1007_v12, %v617_v39  ;;  %703 = vst.msk [vmem:[%s1013_s11 + $0x40] sm:$0xff] %vm344_vm0, %v617_v39 }
 0x12c   : > { %vm586_vm5 = vcmp.gt.f32.partialorder %v554_v38, 0.0  ;;  %v599_v41 = vmul.f32 0.2, %v554_v38 }
 0x12d   : > { %v571_v42 = vpop.f32.mrf.mxu2  ;;  %v664_v43 = vsel %vm344_vm0, %v635_v40, 0.0 }
 0x12e   : > { %v572_v45 = vadd.f32 %v1001_v9, %v571_v42  ;;  %665 = vadd.xlane.f32.xlu2 %v664_v43  ;;  %647 = vadd.xlane.f32.xlu1 %v646_v44  ;;  %v612_v46 = vsel %vm586_vm5, %v554_v38, %v599_v41 }
 0x12f   : > { %698 = vst.msk [vmem:[%s1013_s11 + $0x18] sm:$0xff] %vm344_vm0, %v612_v46  ;;  %v630_v49 = vmul.f32 %v1007_v12, %v612_v46 }
 0x130   : > { %vm592_vm6 = vcmp.gt.f32.partialorder %v572_v45, 0.0  ;;  %v605_v47 = vmul.f32 0.2, %v572_v45 }
 0x131   : > { %v556_v48 = vpop.f32.mrf.mxu1  ;;  %v649_v55 = vsel %vm344_vm0, %v630_v49, 0.0 }
 0x132   : > { %v557_v50 = vadd.f32 %v1001_v9, %v556_v48  ;;  %v618_v51 = vsel %vm592_vm6, %v572_v45, %v605_v47 }
 0x133   : > { %v636_v52 = vmul.f32 %v1007_v12, %v618_v51  ;;  %704 = vst.msk [vmem:[%s1013_s11 + $0x48] sm:$0xff] %vm344_vm0, %v618_v51 }
 0x134   : > { %vm587_vm7 = vcmp.gt.f32.partialorder %v557_v50, 0.0  ;;  %v600_v53 = vmul.f32 0.2, %v557_v50 }
 0x135   : > { %v574_v54 = vpop.f32.mrf.mxu2  ;;  %v667_v56 = vsel %vm344_vm0, %v636_v52, 0.0 }
 0x136   : > { %v575_v57 = vadd.f32 %v1001_v9, %v574_v54  ;;  %650 = vadd.xlane.f32.xlu1 %v649_v55  ;;  %668 = vadd.xlane.f32.xlu0 %v667_v56  ;;  %v613_v58 = vsel %vm587_vm7, %v557_v50, %v600_v53 }
 0x137   : > { %v631_v59 = vmul.f32 %v1007_v12, %v613_v58  ;;  %699 = vst.msk [vmem:[%s1013_s11 + $0x20] sm:$0xff] %vm344_vm0, %v613_v58 }
 0x138   : > { %vm593_vm8 = vcmp.gt.f32.partialorder %v575_v57, 0.0  ;;  %v606_v60 = vmul.f32 0.2, %v575_v57 }
 0x139   : > { %v559_v61 = vpop.f32.mrf.mxu1  ;;  %v652_v62 = vsel %vm344_vm0, %v631_v59, 0.0 }
 0x13a   : > { %v560_v63 = vadd.f32 %v1001_v9, %v559_v61  ;;  %653 = vadd.xlane.f32.xlu2 %v652_v62  ;;  %v619_v0 = vsel %vm593_vm8, %v575_v57, %v606_v60 }
 0x13b   : > { %v637_v1 = vmul.f32 %v1007_v12, %v619_v0  ;;  %705 = vst.msk [vmem:[%s1013_s11 + $0x50] sm:$0xff] %vm344_vm0, %v619_v0 }
 0x13c   : > { %vm588_vm9 = vcmp.gt.f32.partialorder %v560_v63, 0.0  ;;  %v601_v2 = vmul.f32 0.2, %v560_v63 }
 0x13d   : > { %v577_v3 = vpop.f32.mrf.mxu2  ;;  %v670_v4 = vsel %vm344_vm0, %v637_v1, 0.0 }
 0x13e   : > { %v578_v5 = vadd.f32 %v1001_v9, %v577_v3  ;;  %671 = vadd.xlane.f32.xlu1 %v670_v4  ;;  %v614_v6 = vsel %vm588_vm9, %v560_v63, %v601_v2 }
 0x13f   : > { %v632_v7 = vmul.f32 %v1007_v12, %v614_v6  ;;  %700 = vst.msk [vmem:[%s1013_s11 + $0x28] sm:$0xff] %vm344_vm0, %v614_v6 }
 0x140   : > { %vm594_vm10 = vcmp.gt.f32.partialorder %v578_v5, 0.0  ;;  %v607_v8 = vmul.f32 0.2, %v578_v5 }
 0x141   : > { %v562_v10 = vpop.f32.mrf.mxu1  ;;  %v655_v11 = vsel %vm344_vm0, %v632_v7, 0.0 }
 0x142   : > { %v563_v13 = vadd.f32 %v1001_v9, %v562_v10  ;;  %656 = vadd.xlane.f32.xlu2 %v655_v11  ;;  %v620_v14 = vsel %vm594_vm10, %v578_v5, %v607_v8 }
 0x143   : > { %706 = vst.msk [vmem:[%s1013_s11 + $0x58] sm:$0xff] %vm344_vm0, %v620_v14  ;;  %v638_v17 = vmul.f32 %v1007_v12, %v620_v14 }
 0x144   : > { %vm589_vm11 = vcmp.gt.f32.partialorder %v563_v13, 0.0  ;;  %v602_v15 = vmul.f32 0.2, %v563_v13 }
 0x145   : > { %v580_v16 = vpop.f32.mrf.mxu2  ;;  %v673_v22 = vsel %vm344_vm0, %v638_v17, 0.0 }
 0x146   : > { %v581_v18 = vadd.f32 %v1001_v9, %v580_v16  ;;  %v615_v19 = vsel %vm589_vm11, %v563_v13, %v602_v15 }
 0x147   : > { %v633_v20 = vmul.f32 %v1007_v12, %v615_v19  ;;  %701 = vst.msk [vmem:[%s1013_s11 + $0x30] sm:$0xff] %vm344_vm0, %v615_v19 }
 0x148   : > { %vm595_vm12 = vcmp.gt.f32.partialorder %v581_v18, 0.0  ;;  %v608_v21 = vmul.f32 0.2, %v581_v18 }
 0x149   : > { %v658_v23 = vsel %vm344_vm0, %v633_v20, 0.0 }
 0x14a   : > { %674 = vadd.xlane.f32.xlu2 %v673_v22  ;;  %659 = vadd.xlane.f32.xlu0 %v658_v23  ;;  %v621_v24 = vsel %vm595_vm12, %v581_v18, %v608_v21 }
 0x14b   : > { %707 = vst.msk [vmem:[%s1013_s11 + $0x60] sm:$0xff] %vm344_vm0, %v621_v24  ;;  %v639_v25 = vmul.f32 %v1007_v12, %v621_v24 }
 0x14d   : > { %v676_v9 = vsel %vm344_vm0, %v639_v25, 0.0 }
 0x152   : > { %677 = vadd.xlane.f32.xlu0 %v676_v9 }
 0x18d   : > { %v642_v27 = vpop.xlane.xlu0 %641 }
 0x18e   : > { %v682_v28 = vadd.f32 %v865_v26, %v642_v27 }
 0x190   : > { %709 = vst.msk [vmem:[%s1083_s15] sm:$0xff] %vm708_vm13, %v682_v28 }
 0x195   : > { %v645_v12 = vpop.xlane.xlu0 %644 }
 0x196   : > { %v683_v29 = vadd.f32 %v865_v26, %v645_v12 }
 0x198   : > { %710 = vst.msk [vmem:[%s1083_s15 + $0x8] sm:$0xff] %vm708_vm13, %v683_v29 }
 0x199   : > { %v663_v30 = vpop.xlane.xlu1 %662 }
 0x19a   : > { %v689_v31 = vadd.f32 %v865_v26, %v663_v30 }
 0x19c   : > { %716 = vst.msk [vmem:[%s1083_s15 + $0x38] sm:$0xff] %vm708_vm13, %v689_v31 }
 0x1a1   : > { %v666_v32 = vpop.xlane.xlu2 %665  ;;  %v648_v33 = vpop.xlane.xlu1 %647 }
 0x1a2   : > { %v690_v34 = vadd.f32 %v865_v26, %v666_v32  ;;  %v684_v35 = vadd.f32 %v865_v26, %v648_v33 }
 0x1a4   : > { %717 = vst.msk [vmem:[%s1083_s15 + $0x40] sm:$0xff] %vm708_vm13, %v690_v34 }
 0x1a5   : > { %711 = vst.msk [vmem:[%s1083_s15 + $0x10] sm:$0xff] %vm708_vm13, %v684_v35 }
 0x1a9   : > { %v651_v36 = vpop.xlane.xlu1 %650  ;;  %v669_v37 = vpop.xlane.xlu0 %668 }
 0x1aa   : > { %v685_v38 = vadd.f32 %v865_v26, %v651_v36  ;;  %v691_v39 = vadd.f32 %v865_v26, %v669_v37 }
 0x1ac   : > { %712 = vst.msk [vmem:[%s1083_s15 + $0x18] sm:$0xff] %vm708_vm13, %v685_v38 }
 0x1ad   : > { %718 = vst.msk [vmem:[%s1083_s15 + $0x48] sm:$0xff] %vm708_vm13, %v691_v39  ;;  %v654_v40 = vpop.xlane.xlu2 %653 }
 0x1ae   : > { %v686_v41 = vadd.f32 %v865_v26, %v654_v40 }
 0x1b0   : > { %713 = vst.msk [vmem:[%s1083_s15 + $0x20] sm:$0xff] %vm708_vm13, %v686_v41 }
 0x1b1   : > { %v672_v42 = vpop.xlane.xlu1 %671 }
 0x1b2   : > { %v692_v43 = vadd.f32 %v865_v26, %v672_v42 }
 0x1b4   : > { %719 = vst.msk [vmem:[%s1083_s15 + $0x50] sm:$0xff] %vm708_vm13, %v692_v43 }
 0x1b5   : > { %v657_v44 = vpop.xlane.xlu2 %656 }
 0x1b6   : > { %v687_v45 = vadd.f32 %v865_v26, %v657_v44 }
 0x1b8   : > { %714 = vst.msk [vmem:[%s1083_s15 + $0x28] sm:$0xff] %vm708_vm13, %v687_v45 }
 0x1bd   : > { %v675_v46 = vpop.xlane.xlu2 %674  ;;  %v660_v47 = vpop.xlane.xlu0 %659 }
 0x1be   : > { %v693_v48 = vadd.f32 %v865_v26, %v675_v46  ;;  %v688_v49 = vadd.f32 %v865_v26, %v660_v47 }
 0x1c0   : > { %720 = vst.msk [vmem:[%s1083_s15 + $0x58] sm:$0xff] %vm708_vm13, %v693_v48 }
 0x1c1   : > { %715 = vst.msk [vmem:[%s1083_s15 + $0x30] sm:$0xff] %vm708_vm13, %v688_v49 }
 0x1c5   : > { %v678_v50 = vpop.xlane.xlu0 %677 }
 0x1c6   : > { %v694_v51 = vadd.f32 %v865_v26, %v678_v50 }
 0x1c8   : > { %721 = vst.msk [vmem:[%s1083_s15 + $0x60] sm:$0xff] %vm708_vm13, %v694_v51 }
 0x1c9 PF: > { %s21_s29 = sadd.s32 1, %s872_s29  }
 0x1ca   : > { %p18_p4 = scmp.ge.s32.totalorder %s21_s29, 4  }
 0x1cc   :  { %20 = sbr.rel (!%p18_p4) target bundleno = 3 (0x3), region = 90 }

</bundles_post_ra>
